<compile_context>
chip_gen: v7x
topology: tpu7x:2x2x1
jax: 0.10.0
libtpu: 0.0.40
codegen_flags: <defaults>
</compile_context>

<pallas_src>
import math

import jax
import jax.numpy as jnp
import numpy as np
from jax.experimental import pallas as pl
from jax.experimental.pallas import tpu as pltpu


# Fresnel-style constant, computed at trace/compile time (matches reference).
_R0 = 0.04
_T0 = 1.0 - _R0
_R_TOTAL = _R0 + _T0 * _T0 * _R0 / (1.0 - _R0 * _R0)   # 0.076923...

_LANES = 128        # vreg lane width
_ROW_CAP = 1024     # max sublane rows per block (packed path):
                    #   1024*128*4 B = 512 KiB / operand / buffer,
                    #   7 operands * 2 buffers ~= 7.2 MiB VMEM
_LANE_CAP = 16384   # max lanes per block ([1, 3N] fallback path)


def _thin_dielectric_kernel(light_ref, inv3_ref, dalb_ref, salb_ref,
                            diff_ref, spec_ref, rgb_ref):
    """Pure elementwise body; valid for any 2-D block shape."""
    li = light_ref[...] * inv3_ref[...]                   # light / (d^2 + eps)
    diffuse = li * dalb_ref[...] * jnp.float32(1e-4)
    specular = li * salb_ref[...] * jnp.float32(_R_TOTAL)
    diff_ref[...] = diffuse
    spec_ref[...] = specular
    rgb_ref[...] = diffuse + specular


def _round_up(x, m):
    return ((x + m - 1) // m) * m


def _plan_packed(m_rows):
    """Rows-per-block + grid for the fully packed [M, 128] path."""
    if m_rows <= 16:
        return m_rows, 1                    # single block == full array extent
    n_blocks = max(4, pl.cdiv(m_rows, _ROW_CAP))   # >=4 blocks: v7x 2-TC + pipeline
    bs = _round_up(pl.cdiv(m_rows, n_blocks), 8)
    return bs, pl.cdiv(m_rows, bs)


def _plan_fallback(flat_len):
    """Lanes-per-block + grid for the [1, 3N] ragged fallback path."""
    if flat_len <= _LANES:
        return flat_len, 1                  # block last dim == full array extent
    n_blocks = max(2, pl.cdiv(flat_len, _LANE_CAP))
    bn = _round_up(pl.cdiv(flat_len, n_blocks), _LANES)
    return bn, pl.cdiv(flat_len, bn)


@jax.jit
def _render_impl(light, distance, diffuse_albedo, specular_albedo):
    dtype = jnp.float32
    batch_shape = light.shape[:-1]
    full_shape = batch_shape + (3,)
    n = int(math.prod(batch_shape)) if batch_shape else 1
    flat_len = 3 * n

    light = jnp.asarray(light, dtype)
    distance = jnp.asarray(distance, dtype)
    dalb = jnp.asarray(diffuse_albedo, dtype)
    salb = jnp.asarray(specular_albedo, dtype)

    # Per-point 1/(d^2 + eps), broadcast to the 3 channels in the jitted
    # wrapper (single fused XLA op). Keeps the kernel purely elementwise on
    # the native interleaved layout -- no transposes anywhere.
    inv3 = jnp.broadcast_to(1.0 / (distance * distance + jnp.float32(1e-10)),
                            full_shape)

    packed = (flat_len % _LANES == 0) and (flat_len >= _LANES)
    if packed:
        m_rows = flat_len // _LANES
        view = (m_rows, _LANES)
        bs, grid = _plan_packed(m_rows)
        block = (bs, _LANES)
        index_map = lambda i: (i, 0)
    else:
        view = (1, flat_len)
        bn, grid = _plan_fallback(flat_len)
        block = (1, bn)
        index_map = lambda i: (0, i)

    bspec = pl.BlockSpec(block, index_map)

    outs = pl.pallas_call(
        _thin_dielectric_kernel,
        out_shape=tuple(jax.ShapeDtypeStruct(view, dtype) for _ in range(3)),
        grid_spec=pltpu.PrefetchScalarGridSpec(
            num_scalar_prefetch=0,
            grid=(grid,),
            in_specs=[bspec, bspec, bspec, bspec],
            out_specs=[bspec, bspec, bspec],
        ),
        compiler_params=pltpu.CompilerParams(
            dimension_semantics=("parallel",),   # v7x: shard blocks over 2 TCs
            vmem_limit_bytes=32 * 1024 * 1024,
        ),
    )(light.reshape(view), inv3.reshape(view),
      dalb.reshape(view), salb.reshape(view))

    diffuse_rgb, specular_rgb, rgb = (o.reshape(full_shape) for o in outs)
    return {"diffuse_rgb": diffuse_rgb,
            "specular_rgb": specular_rgb,
            "rgb": rgb}


def thin_dielectric_render(light, distance, normal, viewdir,
                           diffuse_albedo, specular_albedo, alpha):
    """JAX/Pallas equivalent of ThinDielectricRenderer.forward.

    light, normal, viewdir, diffuse_albedo, specular_albedo: [..., 3]
    distance, alpha: [..., 1]
    Returns dict with 'diffuse_rgb', 'specular_rgb', 'rgb' of shape [..., 3].

    normal / viewdir / alpha are accepted for signature parity but are dead
    code in the reference forward (the dot/clamp result is unused), so they
    are never passed to (or DMA'd by) the kernel.
    """
    del normal, viewdir, alpha   # dead in the reference forward
    return _render_impl(light, distance, diffuse_albedo, specular_albedo)


def _reference(light, distance, normal, viewdir, diffuse_albedo,
               specular_albedo, alpha):
    """Pure-JAX reference (direct transcription of the PyTorch forward)."""
    light_intensity = light / (distance * distance + 1e-10)
    dot = jnp.sum(viewdir * normal, axis=-1, keepdims=True)
    dot = jnp.clip(dot, 1e-5, 0.99999)
    del dot
    R = 0.04
    T = 1.0 - R
    R = R + T * T * R / (1.0 - R * R)
    specular_rgb = light_intensity * specular_albedo * R
    diffuse_rgb = light_intensity * diffuse_albedo * 1e-4
    return {"diffuse_rgb": diffuse_rgb,
            "specular_rgb": specular_rgb,
            "rgb": diffuse_rgb + specular_rgb}


def _make_inputs(key, batch):
    ks = jax.random.split(key, 7)
    light = jax.random.uniform(ks[0], batch + (3,), jnp.float32, 0.5, 2.0)
    distance = jax.random.uniform(ks[1], batch + (1,), jnp.float32, 0.5, 3.0)
    normal = jax.random.normal(ks[2], batch + (3,), jnp.float32)
    normal = normal / jnp.linalg.norm(normal, axis=-1, keepdims=True)
    viewdir = jax.random.normal(ks[3], batch + (3,), jnp.float32)
    viewdir = viewdir / jnp.linalg.norm(viewdir, axis=-1, keepdims=True)
    diffuse_albedo = jax.random.uniform(ks[4], batch + (3,), jnp.float32)
    specular_albedo = jax.random.uniform(ks[5], batch + (3,), jnp.float32)
    alpha = jax.random.uniform(ks[6], batch + (1,), jnp.float32, 0.01, 1.0)
    return (light, distance, normal, viewdir, diffuse_albedo,
            specular_albedo, alpha)


if __name__ == "__main__":
    key = jax.random.PRNGKey(0)
    # Shapes chosen to exercise: packed single-block, ragged [1,3N] fallback
    # (with a masked tail block), packed multi-block (exact), and packed
    # multi-block with a masked row tail.
    for batch in [(2, 64), (3, 100), (2048, 16), (50, 128)]:
        args = _make_inputs(key, batch)
        out = thin_dielectric_render(*args)
        jax.block_until_ready(out)
        ref = _reference(*args)
        for k in ("diffuse_rgb", "specular_rgb", "rgb"):
            np.testing.assert_allclose(np.asarray(out[k]), np.asarray(ref[k]),
                                       rtol=1e-5, atol=1e-6)
    print("KERNEL_OK")
</pallas_src>

<mosaic_0001>
module attributes {stable_mosaic.version = 11 : i64} {
  func.func @_thin_dielectric_kernel(%arg0: i32, %arg1: memref<3x128xf32, #tpu.memory_space<vmem>>, %arg2: memref<3x128xf32, #tpu.memory_space<vmem>>, %arg3: memref<3x128xf32, #tpu.memory_space<vmem>>, %arg4: memref<3x128xf32, #tpu.memory_space<vmem>>, %arg5: memref<3x128xf32, #tpu.memory_space<vmem>>, %arg6: memref<3x128xf32, #tpu.memory_space<vmem>>, %arg7: memref<3x128xf32, #tpu.memory_space<vmem>>) attributes {dimension_semantics = [#tpu.dimension_semantics<parallel>], iteration_bounds = array<i64: 1>, scalar_prefetch = 0 : i64, scratch_operands = 0 : i64, tpu.core_type = #tpu.core_type<tc>, window_params = [{transform_indices = @transform_0, window_bounds = array<i64: 3, 128>}, {transform_indices = @transform_1, window_bounds = array<i64: 3, 128>}, {transform_indices = @transform_2, window_bounds = array<i64: 3, 128>}, {transform_indices = @transform_3, window_bounds = array<i64: 3, 128>}, {transform_indices = @transform_4, window_bounds = array<i64: 3, 128>}, {transform_indices = @transform_5, window_bounds = array<i64: 3, 128>}, {transform_indices = @transform_6, window_bounds = array<i64: 3, 128>}]} {
    %c0 = arith.constant 0 : index
    %c0_0 = arith.constant 0 : index
    %0 = vector.load %arg1[%c0, %c0_0] : memref<3x128xf32, #tpu.memory_space<vmem>>, vector<3x128xf32>
    %c0_1 = arith.constant 0 : index
    %c0_2 = arith.constant 0 : index
    %1 = vector.load %arg2[%c0_1, %c0_2] : memref<3x128xf32, #tpu.memory_space<vmem>>, vector<3x128xf32>
    %2 = arith.mulf %0, %1 : vector<3x128xf32>
    %c0_3 = arith.constant 0 : index
    %c0_4 = arith.constant 0 : index
    %3 = vector.load %arg3[%c0_3, %c0_4] : memref<3x128xf32, #tpu.memory_space<vmem>>, vector<3x128xf32>
    %4 = arith.mulf %2, %3 : vector<3x128xf32>
    %cst = arith.constant 9.99999974E-5 : f32
    %5 = vector.broadcast %cst : f32 to vector<3x128xf32>
    %6 = arith.mulf %4, %5 : vector<3x128xf32>
    %c0_5 = arith.constant 0 : index
    %c0_6 = arith.constant 0 : index
    %7 = vector.load %arg4[%c0_5, %c0_6] : memref<3x128xf32, #tpu.memory_space<vmem>>, vector<3x128xf32>
    %8 = arith.mulf %2, %7 : vector<3x128xf32>
    %cst_7 = arith.constant 0.0769230798 : f32
    %9 = vector.broadcast %cst_7 : f32 to vector<3x128xf32>
    %10 = arith.mulf %8, %9 : vector<3x128xf32>
    %c0_8 = arith.constant 0 : index
    %c0_9 = arith.constant 0 : index
    %11 = vector.load %arg5[%c0_8, %c0_9] : memref<3x128xf32, #tpu.memory_space<vmem>>, vector<3x128xf32>
    tpu.vector_store %arg5[%c0_8, %c0_9], %6 {strides = array<i32>} : memref<3x128xf32, #tpu.memory_space<vmem>>, vector<3x128xf32>,
    %c0_10 = arith.constant 0 : index
    %c0_11 = arith.constant 0 : index
    %12 = vector.load %arg6[%c0_10, %c0_11] : memref<3x128xf32, #tpu.memory_space<vmem>>, vector<3x128xf32>
    tpu.vector_store %arg6[%c0_10, %c0_11], %10 {strides = array<i32>} : memref<3x128xf32, #tpu.memory_space<vmem>>, vector<3x128xf32>,
    %13 = arith.addf %6, %10 : vector<3x128xf32>
    %c0_12 = arith.constant 0 : index
    %c0_13 = arith.constant 0 : index
    %14 = vector.load %arg7[%c0_12, %c0_13] : memref<3x128xf32, #tpu.memory_space<vmem>>, vector<3x128xf32>
    tpu.vector_store %arg7[%c0_12, %c0_13], %13 {strides = array<i32>} : memref<3x128xf32, #tpu.memory_space<vmem>>, vector<3x128xf32>,
    return
  }
  func.func @transform_0(%arg0: i32) -> (i32, i32) {
    %c0_i32 = arith.constant 0 : i32
    %c0_i32_0 = arith.constant 0 : i32
    return %arg0, %c0_i32 : i32, i32
  }
  func.func @transform_1(%arg0: i32) -> (i32, i32) {
    %c0_i32 = arith.constant 0 : i32
    %c0_i32_0 = arith.constant 0 : i32
    return %arg0, %c0_i32 : i32, i32
  }
  func.func @transform_2(%arg0: i32) -> (i32, i32) {
    %c0_i32 = arith.constant 0 : i32
    %c0_i32_0 = arith.constant 0 : i32
    return %arg0, %c0_i32 : i32, i32
  }
  func.func @transform_3(%arg0: i32) -> (i32, i32) {
    %c0_i32 = arith.constant 0 : i32
    %c0_i32_0 = arith.constant 0 : i32
    return %arg0, %c0_i32 : i32, i32
  }
  func.func @transform_4(%arg0: i32) -> (i32, i32) {
    %c0_i32 = arith.constant 0 : i32
    %c0_i32_0 = arith.constant 0 : i32
    return %arg0, %c0_i32 : i32, i32
  }
  func.func @transform_5(%arg0: i32) -> (i32, i32) {
    %c0_i32 = arith.constant 0 : i32
    %c0_i32_0 = arith.constant 0 : i32
    return %arg0, %c0_i32 : i32, i32
  }
  func.func @transform_6(%arg0: i32) -> (i32, i32) {
    %c0_i32 = arith.constant 0 : i32
    %c0_i32_0 = arith.constant 0 : i32
    return %arg0, %c0_i32 : i32, i32
  }
}

</mosaic_0001>

<bundles_post_ra>
// kernel: _render_impl.1
= control target key start
LH: loop header
LB: loop body
LE: loop exit
PB: predicated region body
PF: predicated region fallthrough
CT: control target
= control target key end

     0   :  { %s101_s0 = inlined_call_operand.vmem [shape: f32[3,128], index: 0, kind: input, shape index: {}]   ;;  %s102_s1 = inlined_call_operand.vmem [shape: f32[3,128], index: 1, kind: input, shape index: {}]   ;;  %s103_s2 = inlined_call_operand.vmem [shape: f32[3,128], index: 2, kind: input, shape index: {}]   ;;  %s104_s3 = inlined_call_operand.vmem [shape: f32[3,128], index: 3, kind: input, shape index: {}]   ;;  %s105_s4 = inlined_call_operand.vmem [shape: f32[3,128], index: 4, kind: output, shape index: {0}]   ;;  %s106_s5 = inlined_call_operand.vmem [shape: f32[3,128], index: 5, kind: output, shape index: {1}]   ;;  %s107_s6 = inlined_call_operand.vmem [shape: f32[3,128], index: 6, kind: output, shape index: {2}]  }
   0x1   :  { %v20_v0 = vld [vmem:[%s101_s0] sm:$0x7] }
   0x2   :  { %v21_v1 = vld [vmem:[%s102_s1] sm:$0x7] }
   0x3   :  { %v23_v2 = vld [vmem:[%s103_s2] sm:$0x7]  ;;  %v22_v3 = vmul.f32 %v21_v1, %v20_v0 }
   0x4   :  { %v26_v4 = vld [vmem:[%s104_s3] sm:$0x7] }
   0x5   :  { %v24_v5 = vmul.f32 %v23_v2, %v22_v3  ;;  %v27_v6 = vmul.f32 %v26_v4, %v22_v3 }
   0x7   :  { %v25_v7 = vmul.f32 0.0001, %v24_v5  ;;  %v28_v8 = vmul.f32 0.07692308, %v27_v6 }
   0x9   :  { %29 = vst [vmem:[%s105_s4] sm:$0x7] %v25_v7  ;;  %30 = vst [vmem:[%s106_s5] sm:$0x7] %v28_v8  ;;  %v31_v9 = vadd.f32 %v28_v8, %v25_v7 }
   0xb   :  { %32 = vst [vmem:[%s107_s6] sm:$0x7] %v31_v9 }

</bundles_post_ra>
